<compile_context>
chip_gen: v7x
topology: tpu7x:2x2x1
jax: 0.10.0
libtpu: 0.0.40
codegen_flags: <defaults>
</compile_context>

<pallas_src>
import jax
import jax.numpy as jnp
from jax.experimental import pallas as pl
from jax.experimental.pallas import tpu as pltpu


def _round_up(n, m):
    return ((n + m - 1) // m) * m


def _mlp_head_kernel(x_ref, w1_ref, b1_ref, w2_ref, b2_ref, o_ref):
    # fc1: bf16 MXU matmul, f32 accumulate; bias + ReLU in f32.
    h = jnp.dot(x_ref[...], w1_ref[...], preferred_element_type=jnp.float32)
    h = jnp.maximum(h + b1_ref[...], 0.0)
    # fc2: feed h back to the MXU in bf16 (also halves vreg pressure of h).
    y = jnp.dot(h.astype(jnp.bfloat16), w2_ref[...],
                preferred_element_type=jnp.float32)
    y = jnp.maximum(y + b2_ref[...], 0.0)
    o_ref[...] = y.astype(o_ref.dtype)


def mlp_feature_head(x, w1, b1, w2, b2, num_pose, feature_size, *, bm=None):
    """x: (B, input_dim) f32.  w1: (input_dim, 256), w2: (256, P*F), stored
    (in, out).  Returns (B, num_pose, feature_size) f32."""
    B, in_dim = x.shape
    hidden = w1.shape[1]
    out_dim = w2.shape[1]
    assert out_dim == num_pose * feature_size

    # --- Lane-dense output: pad fc2 columns to a multiple of 128. -----------
    out_dim_p = _round_up(out_dim, 128)
    if out_dim_p != out_dim:
        w2 = jnp.pad(w2, ((0, 0), (0, out_dim_p - out_dim)))
        b2 = jnp.pad(b2, ((0, out_dim_p - out_dim),))

    # --- Batch tile choice. --------------------------------------------------
    # Default 256 rows (good MXU occupancy on v6e/v7x, still 128-aligned for
    # v5e); never over-pad tiny batches; keep a multiple of 8 sublanes; keep
    # >= 2 grid steps when the batch allows so v7x megacore can split it.
    if bm is None:
        bm = 256
    bm = _round_up(bm, 8)
    bm = min(bm, _round_up(B, 8))
    if B > 16 and _round_up(B, bm) // bm < 2:
        bm = _round_up(pl.cdiv(B, 2), 8)

    # --- Batch padding (replaces the old hard `B % bm == 0` assert). --------
    grid_b = pl.cdiv(B, bm)
    B_pad = grid_b * bm
    if B_pad != B:
        x = jnp.pad(x, ((0, B_pad - B), (0, 0)))

    # --- bf16 inputs to the MXU; biases stay f32 2-D rows. -------------------
    x_bf = x.astype(jnp.bfloat16)
    w1_bf = w1.astype(jnp.bfloat16)
    w2_bf = w2.astype(jnp.bfloat16)
    b1_2d = b1.reshape(1, hidden).astype(jnp.float32)
    b2_2d = b2.reshape(1, out_dim_p).astype(jnp.float32)

    # --- VMEM budget: resident weights + double-buffered batch tiles. -------
    weight_bytes = (in_dim * hidden + hidden * out_dim_p) * 2 \
        + (hidden + out_dim_p) * 4
    tile_bytes = bm * in_dim * 2 + bm * out_dim_p * 4
    vmem_needed = 2 * (weight_bytes + tile_bytes) + (8 << 20)  # 2x buffering + slack
    vmem_limit = int(min(max(vmem_needed, 32 << 20), 64 << 20))

    out_flat = pl.pallas_call(
        _mlp_head_kernel,
        out_shape=jax.ShapeDtypeStruct((B_pad, out_dim_p), jnp.float32),
        grid_spec=pltpu.PrefetchScalarGridSpec(
            num_scalar_prefetch=0,
            grid=(grid_b,),
            in_specs=[
                pl.BlockSpec((bm, in_dim), lambda i: (i, 0)),         # x tile
                pl.BlockSpec((in_dim, hidden), lambda i: (0, 0)),     # W1 (resident)
                pl.BlockSpec((1, hidden), lambda i: (0, 0)),          # b1
                pl.BlockSpec((hidden, out_dim_p), lambda i: (0, 0)),  # W2 (resident)
                pl.BlockSpec((1, out_dim_p), lambda i: (0, 0)),       # b2
            ],
            out_specs=pl.BlockSpec((bm, out_dim_p), lambda i: (i, 0)),
        ),
        compiler_params=pltpu.CompilerParams(
            dimension_semantics=("parallel",),
            vmem_limit_bytes=vmem_limit,
        ),
    )(x_bf, w1_bf, b1_2d, w2_bf, b2_2d)

    # Drop batch / column padding and reshape to (B, P, F).
    return out_flat[:B, :out_dim].reshape(-1, num_pose, feature_size)


if __name__ == "__main__":
    # Small shapes; batch and out_dim chosen to exercise both padding paths
    # (batch not divisible by the tile; P*F = 96 padded to 128 lanes).
    batch = 96
    input_dim = 32
    hidden = 256
    num_pose = 4
    feature_size = 24
    out_dim = num_pose * feature_size

    key = jax.random.PRNGKey(0)
    kx, kw1, kb1, kw2, kb2 = jax.random.split(key, 5)

    x = jax.random.normal(kx, (batch, input_dim), dtype=jnp.float32)
    # Deterministic synthetic parameters (stored as (in, out)).
    w1 = jax.random.normal(kw1, (input_dim, hidden), dtype=jnp.float32) * 0.05
    b1 = jax.random.normal(kb1, (hidden,), dtype=jnp.float32) * 0.05
    w2 = jax.random.normal(kw2, (hidden, out_dim), dtype=jnp.float32) * 0.05
    b2 = jax.random.normal(kb2, (out_dim,), dtype=jnp.float32) * 0.05

    out = mlp_feature_head(x, w1, b1, w2, b2, num_pose, feature_size)
    out = jax.block_until_ready(out)
    assert out.shape == (batch, num_pose, feature_size)

    # Reference 1: bf16-matched (same MXU dtype path as the kernel).
    h_ref = jnp.dot(x.astype(jnp.bfloat16), w1.astype(jnp.bfloat16),
                    preferred_element_type=jnp.float32) + b1
    h_ref = jnp.maximum(h_ref, 0.0)
    ref_bf = jnp.dot(h_ref.astype(jnp.bfloat16), w2.astype(jnp.bfloat16),
                     preferred_element_type=jnp.float32) + b2
    ref_bf = jnp.maximum(ref_bf, 0.0).reshape(-1, num_pose, feature_size)
    assert jnp.allclose(out, ref_bf, atol=2e-3, rtol=2e-3)

    # Reference 2: pure f32 math (looser tolerance due to bf16 MXU inputs).
    ref = jnp.maximum(x @ w1 + b1, 0.0)
    ref = jnp.maximum(ref @ w2 + b2, 0.0).reshape(-1, num_pose, feature_size)
    assert jnp.allclose(out, ref, atol=5e-2, rtol=5e-2)

    print("KERNEL_OK")
</pallas_src>

<mosaic_0001>
module attributes {stable_mosaic.version = 11 : i64} {
  func.func @_mlp_head_kernel(%arg0: i32, %arg1: memref<48x32xbf16, #tpu.memory_space<vmem>>, %arg2: memref<32x256xbf16, #tpu.memory_space<vmem>>, %arg3: memref<1x256xf32, #tpu.memory_space<vmem>>, %arg4: memref<256x128xbf16, #tpu.memory_space<vmem>>, %arg5: memref<1x128xf32, #tpu.memory_space<vmem>>, %arg6: memref<48x128xf32, #tpu.memory_space<vmem>>) attributes {dimension_semantics = [#tpu.dimension_semantics<parallel>], iteration_bounds = array<i64: 2>, scalar_prefetch = 0 : i64, scratch_operands = 0 : i64, tpu.core_type = #tpu.core_type<tc>, window_params = [{transform_indices = @transform_0, window_bounds = array<i64: 48, 32>}, {pipeline_mode = #tpu.pipeline_mode<synchronous>, transform_indices = @transform_1, window_bounds = array<i64: 32, 256>}, {pipeline_mode = #tpu.pipeline_mode<synchronous>, transform_indices = @transform_2, window_bounds = array<i64: 1, 256>}, {pipeline_mode = #tpu.pipeline_mode<synchronous>, transform_indices = @transform_3, window_bounds = array<i64: 256, 128>}, {pipeline_mode = #tpu.pipeline_mode<synchronous>, transform_indices = @transform_4, window_bounds = array<i64: 1, 128>}, {transform_indices = @transform_5, window_bounds = array<i64: 48, 128>}]} {
    %c0 = arith.constant 0 : index
    %c0_0 = arith.constant 0 : index
    %0 = vector.load %arg1[%c0, %c0_0] : memref<48x32xbf16, #tpu.memory_space<vmem>>, vector<48x32xbf16>
    %c0_1 = arith.constant 0 : index
    %c0_2 = arith.constant 0 : index
    %1 = vector.load %arg2[%c0_1, %c0_2] : memref<32x256xbf16, #tpu.memory_space<vmem>>, vector<32x256xbf16>
    %cst = arith.constant dense<0.000000e+00> : vector<48x256xf32>
    %2 = tpu.matmul %0, %1, %cst {dimension_numbers = #tpu.dot_dimension_numbers<[1], [0], [0], [1], [0, 0, 1, 1], [], []>} : vector<48x32xbf16>, vector<32x256xbf16>, vector<48x256xf32> -> vector<48x256xf32>
    %c0_3 = arith.constant 0 : index
    %c0_4 = arith.constant 0 : index
    %3 = vector.load %arg3[%c0_3, %c0_4] : memref<1x256xf32, #tpu.memory_space<vmem>>, vector<1x256xf32>
    %4 = vector.broadcast %3 : vector<1x256xf32> to vector<48x256xf32>
    %5 = arith.addf %2, %4 : vector<48x256xf32>
    %cst_5 = arith.constant 0.000000e+00 : f32
    %6 = vector.broadcast %cst_5 : f32 to vector<48x256xf32>
    %7 = arith.maximumf %5, %6 : vector<48x256xf32>
    %8 = arith.truncf %7 : vector<48x256xf32> to vector<48x256xbf16>
    %c0_6 = arith.constant 0 : index
    %c0_7 = arith.constant 0 : index
    %9 = vector.load %arg4[%c0_6, %c0_7] : memref<256x128xbf16, #tpu.memory_space<vmem>>, vector<256x128xbf16>
    %cst_8 = arith.constant dense<0.000000e+00> : vector<48x128xf32>
    %10 = tpu.matmul %8, %9, %cst_8 {dimension_numbers = #tpu.dot_dimension_numbers<[1], [0], [0], [1], [0, 0, 1, 1], [], []>} : vector<48x256xbf16>, vector<256x128xbf16>, vector<48x128xf32> -> vector<48x128xf32>
    %c0_9 = arith.constant 0 : index
    %c0_10 = arith.constant 0 : index
    %11 = vector.load %arg5[%c0_9, %c0_10] : memref<1x128xf32, #tpu.memory_space<vmem>>, vector<1x128xf32>
    %12 = vector.broadcast %11 : vector<1x128xf32> to vector<48x128xf32>
    %13 = arith.addf %10, %12 : vector<48x128xf32>
    %cst_11 = arith.constant 0.000000e+00 : f32
    %14 = vector.broadcast %cst_11 : f32 to vector<48x128xf32>
    %15 = arith.maximumf %13, %14 : vector<48x128xf32>
    %c0_12 = arith.constant 0 : index
    %c0_13 = arith.constant 0 : index
    %16 = vector.load %arg6[%c0_12, %c0_13] : memref<48x128xf32, #tpu.memory_space<vmem>>, vector<48x128xf32>
    tpu.vector_store %arg6[%c0_12, %c0_13], %15 {strides = array<i32>} : memref<48x128xf32, #tpu.memory_space<vmem>>, vector<48x128xf32>,
    return
  }
  func.func @transform_0(%arg0: i32) -> (i32, i32) {
    %c0_i32 = arith.constant 0 : i32
    %c0_i32_0 = arith.constant 0 : i32
    return %arg0, %c0_i32 : i32, i32
  }
  func.func @transform_1(%arg0: i32) -> (i32, i32) {
    %c0_i32 = arith.constant 0 : i32
    %c0_i32_0 = arith.constant 0 : i32
    %c0_i32_1 = arith.constant 0 : i32
    return %c0_i32, %c0_i32_0 : i32, i32
  }
  func.func @transform_2(%arg0: i32) -> (i32, i32) {
    %c0_i32 = arith.constant 0 : i32
    %c0_i32_0 = arith.constant 0 : i32
    %c0_i32_1 = arith.constant 0 : i32
    return %c0_i32, %c0_i32_0 : i32, i32
  }
  func.func @transform_3(%arg0: i32) -> (i32, i32) {
    %c0_i32 = arith.constant 0 : i32
    %c0_i32_0 = arith.constant 0 : i32
    %c0_i32_1 = arith.constant 0 : i32
    return %c0_i32, %c0_i32_0 : i32, i32
  }
  func.func @transform_4(%arg0: i32) -> (i32, i32) {
    %c0_i32 = arith.constant 0 : i32
    %c0_i32_0 = arith.constant 0 : i32
    %c0_i32_1 = arith.constant 0 : i32
    return %c0_i32, %c0_i32_0 : i32, i32
  }
  func.func @transform_5(%arg0: i32) -> (i32, i32) {
    %c0_i32 = arith.constant 0 : i32
    %c0_i32_0 = arith.constant 0 : i32
    return %arg0, %c0_i32 : i32, i32
  }
}

</mosaic_0001>

<bundles_post_ra>
// kernel: tpu_custom_call.1
= control target key start
LH: loop header
LB: loop body
LE: loop exit
PB: predicated region body
PF: predicated region fallthrough
CT: control target
= control target key end

     0   :  { %10 = vsyncpa [#allocation3], 0  ;;  %s1160_s0 = inlined_call_operand.vmem [shape: bf16[96,32], index: 0, kind: input, shape index: {}]   ;;  %s1161_s1 = inlined_call_operand.vmem [shape: bf16[32,256], index: 1, kind: input, shape index: {}]   ;;  %s1162_s2 = inlined_call_operand.vmem [shape: f32[1,256], index: 2, kind: input, shape index: {}]   ;;  %s1163_s3 = inlined_call_operand.hbm [shape: bf16[256,128], index: 3, kind: input, shape index: {}]   ;;  %s1164_s4 = inlined_call_operand.vmem [shape: f32[1,128], index: 4, kind: input, shape index: {}]   ;;  %s1165_s5 = inlined_call_operand.hbm [shape: f32[96,128], index: 5, kind: output, shape index: {}]  }
   0x1   :  { %11 = vsyncpa [#allocation4], 0 }
   0x2   :  { %13 = vsyncpa [#allocation4 + $0x1], 0  ;;  %s984_s18 = smov 0   ;;  %s986_s19 = smov 0  }
   0x3   :  { %s988_s20 = smov 0   ;;  %s990_s21 = smov 0  }
   0x4 LB: > { %s1005_s22 = sadd.s32 4294967295, %s945_s21   ;;  %s682_s23 = sadd.s32 4294967294, %s945_s21   ;;  %s945_s21 = sphi %s990_s21, %s1181_s21   ;;  %s941_s20 = sphi %s988_s20, %s1180_s20   ;;  %s937_s19 = sphi %s986_s19, %s1179_s19   ;;  %s933_s18 = sphi %s984_s18, %s1178_s18  }
   0x5   : > { %s1009_s24 = sadd.s32 1, %s945_s21   ;;  %s136_s25 = sadd.s32 1, %s941_s20 }
   0x6   : > { %s133_s26 = ssub.s32 %s945_s21, %s1009_s24  ;;  %p146_p0 = scmp.ne.s32.totalorder %s941_s20, %s937_s19 }
   0x7   : > { %p134_p1 = scmp.eq.s32.totalorder %s133_s26, 0  ;;  %p147_p2 = scmp.eq.s32.totalorder %s1005_s22, 1 }
   0x8   : > { %p152_p3 = scmp.ne.s32.totalorder %s937_s19, %s933_s18  ;;  %p153_p4 = scmp.eq.s32.totalorder %s682_s23, 1 }
   0x9   : > { %s1020_s27 = scalar_select %p134_p1, %s941_s20, %s136_s25  }
   0xa   : > { %p1022_p5 = por %p147_p2, %p146_p0  ;;  %p1026_p6 = por %p153_p4, %p152_p3 }
   0xb   : > { %p683_p7 = scmp.ge.s32.totalorder %s945_s21, 1  ;;  %p160_p8 = scmp.lt.s32.totalorder %s945_s21, 3 }
   0xc   : > { %s1169_s28 = scalar_select %p1022_p5, 1, 0 }
   0xd   : > { %s1170_s29 = scalar_select %p1026_p6, 1, 0 }
   0xe   : > { %p1166_p9 = scmp.eq.s32.totalorder %s1005_s22, 0  ;;  %p1033_p10 = pnand %p683_p7, %p160_p8 }
   0xf   : > { %s947_s6 = smov [#allocation2]   ;;  %s851_s11 = scalar_lea.hbm %s1163_s3, 2048 }
  0x10   : > { %s1171_s30 = scalar_select %p1033_p10, 1, 0 }
  0x11   : > { %s178_s7 = sshll.u32 %s947_s6, 4  ;;  %p777_p11 = pneg %p1033_p10  ;;  %s179_s7 = int_to_ptr.vmem [resolvable:$true] %s178_s7 }
  0x12   : > { %p852_p13 = scmp.ne.s32.totalorder %s1163_s3, %s851_s11  ;;  %p858_p3 = scmp.lt.u32.totalorder %s851_s11, %s1163_s3 }
  0x13   : > { %p1041_p12 = pnand %p1166_p9, %p777_p11 }
  0x15   : > { %p853_p0 = pneg %p1041_p12 }
  0x17   : > { %p854_p1 = pnand %p853_p0, %p852_p13 }
  0x19   : > { %p855_p2 = pneg %p854_p1 }
  0x1b   : > { %p860_p4 = pnand %p858_p3, %p855_p2 }
  0x1d   : > { %863 = shalt.err (!%p860_p4)
}
  0x1e   : > { %s864_s16 = scalar_lea.vmem %s179_s7, 2048  ;;  %p872_p9 = scmp.lt.s32.totalorder %s179_s7, %s179_s7 }
  0x1f   : > { %p865_p7 = scmp.ne.s32.totalorder %s179_s7, %s864_s16  ;;  %p873_p6 = scmp.lt.s32.totalorder %s864_s16, %s864_s16 }
  0x21   : > { %p867_p8 = pnand %p865_p7, %p853_p0  ;;  %p874_p5 = por %p873_p6, %p872_p9 }
  0x23   : > { %p868_p11 = pneg %p867_p8 }
  0x25   : > { %p875_p10 = pnand %p874_p5, %p868_p11 }
  0x27   : > { %878 = shalt.err (!%p875_p10)
}
  0x28   : > { %s948_s17 = smov 64   ;;  %s949_s23 = smov 4  }
  0x29   : > { %780 = dma.hbm_to_vmem [thread:$0]  (!%p1041_p12), %s1163_s3, 2048, %s179_s7, [#allocation3], %s948_s17, %s948_s17, %s949_s23  }
  0x2a   : > { %p1173_p13 = scmp.ne.s32.totalorder %s1171_s30, 0 }
  0x2b   : > { %p1174_p1 = scmp.eq.s32.totalorder (!%p1173_p13), %s1005_s22, 0 }
  0x2c   : > { %206 = sbr.rel (%p1173_p13) target bundleno = 535 (0x217), region = 40 }
  0x33   : > { %924 = dma.done.wait (%p1174_p1), [#allocation3], 2048   ;;  %p1175_p0 = pmov %p1174_p1 }
  0x34   : > { %s234_s6 = smul.u32 6, %s1005_s22  ;;  %v950_v0 = vmov 0   ;;  %v826_v1 = vld [vmem:[%s1161_s1 + $0x4] ss:$8 sps:$4 sm:$0xff]   ;;  %v828_v2 = vld [vmem:[%s1161_s1] ss:$8 sps:$4 sm:$0xff]   ;;  %v254_v24 = vlaneseq }
  0x35   : > { %926 = vsyncadd (%p1175_p0), [#allocation3], 4294965248  ;;  %341 = vmatprep.mubr.bf16.mxu0 %v950_v0  ;;  %309 = vmatprep.subr.bf16.mxu0 %v826_v1  ;;  %v829_v3 = vld [vmem:[%s1161_s1 + $0x14] ss:$8 sps:$4 sm:$0xff]   ;;  %v831_v4 = vld [vmem:[%s1161_s1 + $0x10] ss:$8 sps:$4 sm:$0xff]  }
  0x36   : > { %p235_p5 = scmp.lt.s32.totalorder %s234_s6, 11  ;;  %310 = vmatpush1.bf16.msra.mxu0 %v828_v2  ;;  %v835_v6 = vld [vmem:[#allocation2 + $0x40] sm:$0xff]   ;;  %vm299_vm0 = vcmask 261120   ;;  %v837_v8 = vld [vmem:[#allocation2 + $0x48] sm:$0xff]   ;;  %v839_v10 = vld [vmem:[#allocation2 + $0x50] sm:$0xff]   ;;  %v255_v25 = vshrl.u32 %v254_v24, 7 }
  0x37   : > { %311 = vmatprep.subr.bf16.mxu0 %v829_v3  ;;  %v836_v7 = vld [vmem:[#allocation2] sm:$0xff]   ;;  %754 = vmatprep.subr.bf16.mxu1 %v835_v6  ;;  %v838_v9 = vld [vmem:[#allocation2 + $0x8] sm:$0xff]   ;;  %v840_v12 = vld [vmem:[#allocation2 + $0x10] sm:$0xff]   ;;  %s231_s26 = sand.u32 1, %s937_s19   ;;  %s719_s7 = smul.u32 768, %s1005_s22 }
  0x38   : > { %s1183_s6 = smov (!%p235_p5, %s234_s6), 11  ;;  %762 = vmatpush3.bf16.msra.mxu1 %v836_v7  ;;  %v841_v13 = vld [vmem:[#allocation2 + $0x58] sm:$0xff]   ;;  %v843_v15 = vld [vmem:[#allocation2 + $0x60] sm:$0xff]   ;;  %v845_v18 = vld [vmem:[#allocation2 + $0x68] sm:$0xff]   ;;  %v256_v26 = vsub.s32 0, %v255_v25  ;;  %v260_v28 = vsub.s32 1, %v255_v25 }
  0x39   : > { %s688_s8 = sshll.u32 %s1183_s6, 2  ;;  %755 = vmatprep.subr.bf16.mxu1 %v837_v8  ;;  %v842_v14 = vld [vmem:[#allocation2 + $0x18] sm:$0xff]   ;;  %v844_v17 = vld [vmem:[#allocation2 + $0x20] sm:$0xff]   ;;  %v846_v19 = vld [vmem:[#allocation2 + $0x28] sm:$0xff]   ;;  %s770_s6 = smul.u32 48, %s231_s26 }
  0x3a   : > { %s1077_s13 = scalar_lea.vmem %s1160_s0, %s688_s8  ;;  %312 = vmatpush1.bf16.msra.mxu0 %v831_v4  ;;  %v847_v20 = vld [vmem:[#allocation2 + $0x70] sm:$0xff]   ;;  %v849_v22 = vld [vmem:[#allocation2 + $0x78] sm:$0xff]   ;;  %v252_v27 = vld [vmem:[%s1162_s2] sm:$0x3]  ;;  %s1119_s22 = scalar_lea.sflag [#allocation4], %s231_s26 }
  0x3b   : > { %v832_v5 = vld [vmem:[%s1077_s13] sm:$0xff]   ;;  %720 = vmatprep.subr.bf16.mxu0 %v835_v6  ;;  %v833_v11 = vld [vmem:[%s1077_s13 + $0x8] sm:$0xff]   ;;  %v834_v16 = vld [vmem:[%s1077_s13 + $0x10] sm:$0xff]   ;;  %v257_v29 = vrot.slane %v252_v27, %v256_v26  ;;  %v261_v30 = vrot.slane %v252_v27, %v260_v28  ;;  %s1100_s10 = scalar_lea.vmem [#allocation5], %s770_s6  ;;  %s1113_s13 = scalar_lea.hbm %s1165_s5, %s719_s7 }
  0x3c   : > { %763 = vmatpush3.bf16.msra.mxu1 %v838_v9  ;;  %v848_v21 = vld [vmem:[#allocation2 + $0x30] sm:$0xff]   ;;  %v850_v23 = vld [vmem:[#allocation2 + $0x38] sm:$0xff]   ;;  %s608_s30 = sshll.u32 %s1100_s10, 4  ;;  %p1176_p9 = scmp.ne.s32.totalorder %s1169_s28, 0  ;;  %s1108_s30 = int_to_ptr.vmem [resolvable:$true] %s608_s30 }
  0x3d   : > { %696 = vmatmul.mubr.msk.bf16.vlgmr.msra.gmra.mrb[0].mxu0 %vm299_vm0, %v832_v5  ;;  %756 = vmatprep.subr.bf16.mxu1 %v839_v10  ;;  %s879_s14 = scalar_lea.vmem %s1108_s30, 768  ;;  %s951_s15 = smov [#allocation5]  }
  0x3e   : > { %351 = vmatprep.mubr.bf16.mxu0 %v950_v0  ;;  %721 = vmatpush3.bf16.msra.mxu0 %v836_v7  ;;  %p880_p6 = scmp.ne.s32.totalorder %s1108_s30, %s879_s14  ;;  %s883_s16 = sshll.u32 %s951_s15, 4  ;;  %s884_s16 = int_to_ptr.vmem [resolvable:$false] %s883_s16 }
  0x3f   : > { %722 = vmatprep.subr.bf16.mxu0 %v837_v8  ;;  %s885_s17 = scalar_lea.vmem %s884_s16, 1536  ;;  %p886_p2 = scmp.lt.s32.totalorder %s1108_s30, %s884_s16 }
  0x40   : > { %764 = vmatpush3.bf16.msra.mxu1 %v840_v12  ;;  %p881_p10 = pnand %p880_p6, %p1176_p9  ;;  %p887_p3 = scmp.lt.s32.totalorder %s885_s17, %s879_s14 }
  0x41   : > { %757 = vmatprep.subr.bf16.mxu1 %v841_v13 }
  0x42   : > { %723 = vmatpush3.bf16.msra.mxu0 %v838_v9  ;;  %p882_p12 = pneg %p881_p10  ;;  %p888_p4 = por %p887_p3, %p886_p2 }
  0x43   : > { %724 = vmatprep.subr.bf16.mxu0 %v839_v10  ;;  %v699_v10 = vld [vmem:[%s1164_s4] ss:$0 sm:$0xff] }
  0x44   : > { %765 = vmatpush3.bf16.msra.mxu1 %v842_v14  ;;  %p889_p7 = pnand %p888_p4, %p882_p12 }
  0x45   : > { %697 = vmatmul.mubr.msk.bf16.gmra.mrb[4].mxu0 %vm299_vm0, %v833_v11  ;;  %758 = vmatprep.subr.bf16.mxu1 %v843_v15 }
  0x46   : > { %361 = vmatprep.mubr.bf16.mxu0 %v950_v0  ;;  %725 = vmatpush3.bf16.msra.mxu0 %v840_v12 }
  0x47   : > { %726 = vmatprep.subr.bf16.mxu0 %v841_v13 }
  0x48   : > { %766 = vmatpush3.bf16.msra.mxu1 %v844_v17 }
  0x49   : > { %759 = vmatprep.subr.bf16.mxu1 %v845_v18 }
  0x4a   : > { %727 = vmatpush3.bf16.msra.mxu0 %v842_v14 }
  0x4b   : > { %728 = vmatprep.subr.bf16.mxu0 %v843_v15 }
  0x4c   : > { %767 = vmatpush3.bf16.msra.mxu1 %v846_v19 }
  0x4d   : > { %698 = vmatmul.mubr.msk.bf16.gmra.mrb[8].mxu0 %vm299_vm0, %v834_v16  ;;  %760 = vmatprep.subr.bf16.mxu1 %v847_v20 }
  0x4e   : > { %729 = vmatpush3.bf16.msra.mxu0 %v844_v17 }
  0x4f   : > { %730 = vmatprep.subr.bf16.mxu0 %v845_v18 }
  0x50   : > { %768 = vmatpush3.bf16.msra.mxu1 %v848_v21 }
  0x51   : > { %761 = vmatprep.subr.bf16.mxu1 %v849_v22 }
  0x52   : > { %731 = vmatpush3.bf16.msra.mxu0 %v846_v19 }
  0x53   : > { %732 = vmatprep.subr.bf16.mxu0 %v847_v20 }
  0x54   : > { %769 = vmatpush3.bf16.msra.mxu1 %v850_v23 }
  0x56   : > { %733 = vmatpush3.bf16.msra.mxu0 %v848_v21 }
  0x57   : > { %734 = vmatprep.subr.bf16.mxu0 %v849_v22 }
  0x5a   : > { %735 = vmatpush3.bf16.msra.mxu0 %v850_v23 }
 0x110   : > { %v343_v31 = vpop.f32.mrb[0].mxu0 }
 0x111   : > { %v344_v32 = vadd.f32 %v343_v31, %v257_v29  ;;  %v345_v33 = vpop.f32.mrb[1].mxu0 }
 0x112   : > { %v346_v34 = vadd.f32 %v345_v33, %v261_v30  ;;  %v347_v35 = vpop.f32.mrb[2].mxu0 }
 0x113   : > { %v348_v36 = vadd.f32 %v347_v35, %v257_v29  ;;  %v349_v37 = vpop.f32.mrb[3].mxu0  ;;  %v372_v39 = vmax.f32 %v344_v32, 0.0 }
 0x114   : > { %v350_v38 = vadd.f32 %v349_v37, %v261_v30  ;;  %v373_v41 = vmax.f32 %v346_v34, 0.0 }
 0x115   : > { %v374_v40 = vmax.f32 %v348_v36, 0.0 }
 0x116   : > { %v375_v42 = vmax.f32 %v350_v38, 0.0 }
 0x117   : > { %v384_v43 = vpack.c.bf16 %v374_v40, %v372_v39 }
 0x118   : > { %v385_v44 = vpack.c.bf16 %v375_v42, %v373_v41  ;;  %v353_v45 = vpop.f32.mrb[4].mxu0 }
 0x119   : > { %v354_v46 = vadd.f32 %v353_v45, %v257_v29  ;;  %v355_v47 = vpop.f32.mrb[5].mxu0 }
 0x11a   : > { %v356_v48 = vadd.f32 %v355_v47, %v261_v30  ;;  %v357_v49 = vpop.f32.mrb[6].mxu0  ;;  %557 = vmatprep.mubr.bf16.mxu0 %v385_v44 }
 0x11b   : > { %v358_v50 = vadd.f32 %v357_v49, %v257_v29  ;;  %v359_v51 = vpop.f32.mrb[7].mxu0  ;;  %558 = vmatmul.mubr.bf16.vlgmr.msra.gmra.mrb[12].mxu0 %v384_v43  ;;  %v376_v53 = vmax.f32 %v354_v46, 0.0 }
 0x11c   : > { %v360_v52 = vadd.f32 %v359_v51, %v261_v30  ;;  %v377_v55 = vmax.f32 %v356_v48, 0.0 }
 0x11d   : > { %v378_v54 = vmax.f32 %v358_v50, 0.0 }
 0x11e   : > { %v379_v56 = vmax.f32 %v360_v52, 0.0 }
 0x11f   : > { %v386_v57 = vpack.c.bf16 %v378_v54, %v376_v53 }
 0x120   : > { %v363_v58 = vpop.f32.mrb[8].mxu0  ;;  %v387_v59 = vpack.c.bf16 %v379_v56, %v377_v55 }
 0x121   : > { %v364_v60 = vadd.f32 %v363_v58, %v257_v29  ;;  %v365_v61 = vpop.f32.mrb[9].mxu0 }
 0x122   : > { %v366_v62 = vadd.f32 %v365_v61, %v261_v30  ;;  %v367_v63 = vpop.f32.mrb[10].mxu0  ;;  %565 = vmatprep.mubr.bf16.mxu1 %v387_v59 }
 0x123   : > { %v368_v0 = vadd.f32 %v367_v63, %v257_v29  ;;  %v369_v1 = vpop.f32.mrb[11].mxu0  ;;  %566 = vmatmul.mubr.bf16.vlgmr.msra.gmra.mrb[0].mxu1 %v386_v57  ;;  %v380_v3 = vmax.f32 %v364_v60, 0.0 }
 0x124   : > { %v370_v2 = vadd.f32 %v369_v1, %v261_v30  ;;  %v381_v5 = vmax.f32 %v366_v62, 0.0 }
 0x125   : > { %v382_v4 = vmax.f32 %v368_v0, 0.0 }
 0x126   : > { %v383_v6 = vmax.f32 %v370_v2, 0.0 }
 0x127   : > { %v388_v7 = vpack.c.bf16 %v382_v4, %v380_v3 }
 0x128   : > { %v389_v8 = vpack.c.bf16 %v383_v6, %v381_v5 }
 0x12a   : > { %573 = vmatprep.mubr.bf16.mxu1 %v389_v8 }
 0x12b   : > { %574 = vmatmul.mubr.bf16.gmra.mrb[4].mxu1 %v388_v7 }
 0x1ee   : > { %v736_v9 = vpop.f32.mrb[12].mxu0 }
 0x1ef   : > { %v737_v11 = vpop.f32.mrb[13].mxu0 }
 0x1f0   : > { %v738_v12 = vadd.f32 %v737_v11, %v736_v9  ;;  %v739_v13 = vpop.f32.mrb[14].mxu0 }
 0x1f1   : > { %v740_v14 = vpop.f32.mrb[15].mxu0 }
 0x1f2   : > { %v560_v15 = vadd.f32 %v738_v12, %v699_v10  ;;  %v741_v16 = vadd.f32 %v740_v14, %v739_v13 }
 0x1f4   : > { %v582_v17 = vmax.f32 %v560_v15, 0.0  ;;  %v563_v18 = vadd.f32 %v741_v16, %v699_v10 }
 0x1f6   : > { %588 = vst [vmem:[%s1100_s10] sm:$0xff] %v582_v17  ;;  %v583_v19 = vmax.f32 %v563_v18, 0.0  ;;  %v742_v20 = vpop.f32.mrb[0].mxu1 }
 0x1f7   : > { %v743_v21 = vpop.f32.mrb[1].mxu1 }
 0x1f8   : > { %589 = vst [vmem:[%s1100_s10 + $0x8] sm:$0xff] %v583_v19  ;;  %v744_v22 = vadd.f32 %v743_v21, %v742_v20  ;;  %v745_v23 = vpop.f32.mrb[2].mxu1 }
 0x1f9   : > { %v746_v24 = vpop.f32.mrb[3].mxu1 }
 0x1fa   : > { %v568_v25 = vadd.f32 %v744_v22, %v699_v10  ;;  %v747_v26 = vadd.f32 %v746_v24, %v745_v23 }
 0x1fc   : > { %v584_v27 = vmax.f32 %v568_v25, 0.0  ;;  %v571_v28 = vadd.f32 %v747_v26, %v699_v10 }
 0x1fe   : > { %590 = vst [vmem:[%s1100_s10 + $0x10] sm:$0xff] %v584_v27  ;;  %v585_v29 = vmax.f32 %v571_v28, 0.0  ;;  %v748_v30 = vpop.f32.mrb[4].mxu1 }
 0x1ff   : > { %v749_v31 = vpop.f32.mrb[5].mxu1 }
 0x200   : > { %591 = vst [vmem:[%s1100_s10 + $0x18] sm:$0xff] %v585_v29  ;;  %v750_v32 = vadd.f32 %v749_v31, %v748_v30  ;;  %v751_v33 = vpop.f32.mrb[6].mxu1 }
 0x201   : > { %v752_v34 = vpop.f32.mrb[7].mxu1 }
 0x202   : > { %v576_v35 = vadd.f32 %v750_v32, %v699_v10  ;;  %v753_v36 = vadd.f32 %v752_v34, %v751_v33 }
 0x204   : > { %v586_v37 = vmax.f32 %v576_v35, 0.0  ;;  %v579_v38 = vadd.f32 %v753_v36, %v699_v10 }
 0x206   : > { %592 = vst [vmem:[%s1100_s10 + $0x20] sm:$0xff] %v586_v37  ;;  %v587_v39 = vmax.f32 %v579_v38, 0.0 }
 0x208   : > { %593 = vst [vmem:[%s1100_s10 + $0x28] sm:$0xff] %v587_v39 }
 0x209   : > { %892 = shalt.err (!%p889_p7)
}
 0x20a   : > { %s893_s23 = scalar_lea.hbm %s1113_s13, 768  ;;  %s897_s6 = scalar_lea.hbm %s1165_s5, 1536 }
 0x20b   : > { %p894_p8 = scmp.ne.s32.totalorder %s1113_s13, %s893_s23  ;;  %p898_p1 = scmp.lt.u32.totalorder %s1113_s13, %s1165_s5 }
 0x20c   : > { %p899_p0 = scmp.lt.u32.totalorder %s897_s6, %s893_s23  ;;  %p901_p6 = scmp.lt.u32.totalorder %s893_s23, %s1113_s13 }
 0x20d   : > { %p895_p11 = pnand %p894_p8, %p1176_p9 }
 0x20e   : > { %p900_p5 = por %p899_p0, %p898_p1 }
 0x20f   : > { %p896_p13 = pneg %p895_p11 }
 0x210   : > { %p902_p10 = por %p901_p6, %p900_p5 }
 0x212   : > { %p903_p12 = pnand %p902_p10, %p896_p13 }
 0x214   : > { %906 = shalt.err (!%p903_p12)
}
 0x215   : > { %s952_s10 = smov 128   ;;  %s953_s7 = smov 8  }
 0x216   : > { %775 = dma.vmem_to_hbm [thread:$0]  (%p1176_p9), %s1108_s30, 768, %s1113_s13, %s1119_s22, %s952_s10, %s952_s10, %s953_s7  }
 0x217 PF: > { %p787_p2 = scmp.ge.s32.totalorder %s945_s21, 2  ;;  %s623_s11 = sand.u32 1, %s933_s18  }
 0x218   : > { %p1177_p3 = scmp.ne.s32.totalorder %s1170_s29, 0  ;;  %s624_s12 = scalar_lea.sflag [#allocation4], %s623_s11 }
 0x21a   : > { %p782_p4 = pnand %p787_p2, %p1177_p3 }
 0x21c   : > { %928 = dma.done.wait (!%p782_p4), %s624_s12, 768  }
 0x21d   : > { %930 = vsyncadd (!%p782_p4), %s624_s12, 4294966528  ;;  %p16_p7 = scmp.ge.s32.totalorder %s1009_s24, 4   ;;  %s1178_s18 = smov %s937_s19 }
 0x21e   : > { %s1179_s19 = smov %s941_s20  ;;  %s1180_s20 = smov %s1020_s27 }
 0x21f   : > { %s1181_s21 = smov %s1009_s24  ;;  %18 = sbr.rel (!%p16_p7) target bundleno = 4 (0x4), region = 80 }
 0x226   :  { %629 = vsyncpa [#allocation3], 1 }
 0x227   :  { %631 = vsyncpa [#allocation3 + $0x1], 1 }
 0x228   :  { %632 = vsyncpa [#allocation4], 1 }
 0x229   :  { %634 = vsyncpa [#allocation4 + $0x1], 1 }

</bundles_post_ra>
